<compile_context>
chip_gen: v7x
topology: tpu7x:2x2x1
jax: 0.10.0
libtpu: 0.0.40
codegen_flags: <defaults>
</compile_context>

<pallas_src>
import functools
import math

import jax
import jax.numpy as jnp
from jax.experimental import pallas as pl
from jax.experimental.pallas import tpu as pltpu


def _rince_kernel(pos_ref, neg_ref, out_ref, acc_ref, *, q: float, lam: float,
                  n_rows: int, tile_n: int, n_cols: int, tile_k: int,
                  exp_dtype):
    """One (batch-tile i, K-tile k) grid step of RINCE.

    pos_ref: (tile_n, 1)      VMEM block of positive scores (resident across k).
    neg_ref: (tile_n, tile_k) VMEM block of negative scores.
    out_ref: (1, 8, 128)      lane-dense partial-sum block (written at last k).
    acc_ref: (tile_n, 1) f32  per-row exp-sum accumulator across K tiles.
    """
    i = pl.program_id(0)
    k = pl.program_id(1)
    nk = pl.num_programs(1)

    @pl.when(k == 0)
    def _():
        acc_ref[...] = jnp.zeros_like(acc_ref)

    # exp of this K tile of negatives: bf16 exp on chips with a bf16 EUP
    # (v6e/v7x), upcast-first otherwise.  Accumulate the K-sum in f32.
    exp_neg = jnp.exp(neg_ref[...].astype(exp_dtype)).astype(jnp.float32)
    if n_cols % tile_k != 0:
        # Last K tile is padded: select padded columns to 0 *before* the row
        # reduction so garbage columns never reach valid rows.
        col_idx = k * tile_k + jax.lax.broadcasted_iota(
            jnp.int32, (tile_n, tile_k), 1)
        exp_neg = jnp.where(col_idx < n_cols, exp_neg, 0.0)
    # Cross-lane reduce on the XLU (MXU is idle; a ones-matmul offload is
    # possible if profiling ever shows the XLU slot saturating at small K).
    acc_ref[...] += jnp.sum(exp_neg, axis=-1, keepdims=True)

    @pl.when(k == nk - 1)
    def _():
        pos = pos_ref[...].astype(jnp.float32)                 # (tile_n, 1)
        denom = jnp.exp(pos) + acc_ref[...]                    # (tile_n, 1)
        if q == 0.0:
            # -log(exp(pos) / denom) == log(denom) - pos
            row_loss = jnp.log(denom) - pos
        else:
            # exp(pos)**q == exp(q*pos)
            pos_term = -jnp.exp(q * pos) / q
            if lam > 0.0:
                # (lam*denom)**q == exp(q*(log lam + log denom))
                neg_term = jnp.exp(q * (math.log(lam) + jnp.log(denom))) / q
            else:
                # lam == 0 (negative-pair-free limit): (0*denom)**q == 0,
                # emitted at trace time (avoids inf/NaN pow-of-zero lowering).
                neg_term = jnp.zeros_like(denom)
            row_loss = pos_term + neg_term
        if n_rows % tile_n != 0:
            # Mask padded tail rows of the last batch tile (trace-time skip
            # when the batch divides evenly).
            row_idx = i * tile_n + jax.lax.broadcasted_iota(
                jnp.int32, (tile_n, 1), 0)
            row_loss = jnp.where(row_idx < n_rows, row_loss, 0.0)
        out_ref[...] = jnp.broadcast_to(jnp.sum(row_loss), (1, 8, 128))


def _has_bf16_eup() -> bool:
    """True on chips with a bf16 EUP/VPU (v6e and newer)."""
    try:
        kind = jax.devices()[0].device_kind.lower()
    except Exception:
        return False
    return not any(t in kind for t in ("v2", "v3", "v4", "v5"))


def _round_up(x: int, m: int) -> int:
    return -(-x // m) * m


def _pick_tiles(N: int, K: int, itemsize: int):
    """Choose (tile_n, tile_k) by block bytes and a VMEM working-set budget."""
    target_block = 4 * 1024 * 1024        # ~2-4 MiB per scores_neg block
    vmem_budget = 24 * 1024 * 1024        # headroom under the 32 MiB scoped
                                          # default (v7x: 64 MiB physical)

    # K tile: whole K when a >=256-row block stays <= target; otherwise a
    # multiple of 128 (the "arbitrary" grid axis reduces across K tiles).
    max_tile_k = max(128, (target_block // (256 * itemsize)) // 128 * 128)
    tile_k = K if K <= max_tile_k else max_tile_k

    tile_n = target_block // (tile_k * itemsize)
    tile_n = max(8, min(4096, (tile_n // 8) * 8))

    def working_set(tn):
        neg = 2 * tn * tile_k * itemsize          # double-buffered neg block
        pos = 2 * tn * 128 * itemsize             # (tn,1) lane-pads to (tn,128)
        acc = tn * 128 * 4                        # f32 accumulator scratch
        return neg + pos + acc

    while tile_n > 8 and working_set(tile_n) > vmem_budget:
        tile_n = max(8, (tile_n // 2) // 8 * 8)

    # Never collapse the batch to one grid step when N allows >= 2 tiles of
    # >= 8 rows: pipelining and v7x dual-TensorCore sharding need >= 2 steps.
    desired_tiles = min(4, N // 8)
    if desired_tiles >= 2:
        tile_n = min(tile_n, _round_up(-(-N // desired_tiles), 8))
    else:
        tile_n = min(tile_n, N)       # tiny batch: single tile == full batch
    return tile_n, tile_k


def rince_loss(scores_pos, scores_neg, q: float = 0.0, lam: float = 0.01,
               *, tile_n: int | None = None, tile_k: int | None = None):
    """Pallas implementation of RINCE.forward.

    scores_pos: (N, 1) float32/bfloat16
    scores_neg: (N, K) float32/bfloat16   (prefer bf16 storage on v5e/v6e:
                                           the kernel streams native dtype)
    returns: scalar float32 loss
    """
    N, K = scores_neg.shape
    if tuple(scores_pos.shape) != (N, 1):
        raise ValueError(f"scores_pos must be (N, 1); got {scores_pos.shape}")

    itemsize = jnp.dtype(scores_neg.dtype).itemsize
    auto_n, auto_k = _pick_tiles(N, K, itemsize)
    if tile_n is None:
        tile_n = auto_n
    if tile_k is None:
        tile_k = auto_k
    num_tiles_n = -(-N // tile_n)
    num_tiles_k = -(-K // tile_k)

    exp_dtype = (jnp.bfloat16
                 if scores_neg.dtype == jnp.bfloat16 and _has_bf16_eup()
                 else jnp.float32)

    kernel = functools.partial(
        _rince_kernel, q=float(q), lam=float(lam),
        n_rows=N, tile_n=tile_n, n_cols=K, tile_k=tile_k, exp_dtype=exp_dtype)

    in_bytes = (N * 1 + N * K) * itemsize
    out_bytes = num_tiles_n * 8 * 128 * 4
    cost = pl.CostEstimate(
        flops=2 * N * K,
        transcendentals=N * (K + 3),
        bytes_accessed=in_bytes + out_bytes,
    )

    partials = pl.pallas_call(
        kernel,
        out_shape=jax.ShapeDtypeStruct((num_tiles_n, 8, 128), jnp.float32),
        grid=(num_tiles_n, num_tiles_k),
        in_specs=[
            pl.BlockSpec((tile_n, 1), lambda i, k: (i, 0)),
            pl.BlockSpec((tile_n, tile_k), lambda i, k: (i, k)),
        ],
        out_specs=pl.BlockSpec((1, 8, 128), lambda i, k: (i, 0, 0)),
        scratch_shapes=[pltpu.VMEM((tile_n, 1), jnp.float32)],
        compiler_params=pltpu.CompilerParams(
            dimension_semantics=("parallel", "arbitrary")),
        cost_estimate=cost,
    )(scores_pos, scores_neg)

    return jnp.sum(partials[:, 0, 0]) / N


def _rince_ref(scores_pos, scores_neg, q=0.0, lam=0.01):
    """Pure-JAX reference mirroring the PyTorch forward exactly."""
    sp = scores_pos.astype(jnp.float32)
    sn = scores_neg.astype(jnp.float32)
    exp_pos = jnp.exp(sp)
    exp_neg = jnp.exp(sn)
    if q == 0.0:
        return -jnp.mean(
            jnp.log(exp_pos / (exp_pos + jnp.sum(exp_neg, -1, keepdims=True))))
    pos = -(exp_pos ** q) / q
    neg = ((lam * (exp_pos + jnp.sum(exp_neg, -1, keepdims=True))) ** q) / q
    return jnp.mean(pos) + jnp.mean(neg)


if __name__ == "__main__":
    key = jax.random.PRNGKey(0)
    k_pos, k_neg = jax.random.split(key)

    N, K = 8, 128  # small batch, #negatives
    scores_pos = jax.random.normal(k_pos, (N, 1), dtype=jnp.float32)
    scores_neg = jax.random.normal(k_neg, (N, K), dtype=jnp.float32)

    # q = 0 branch (InfoNCE limit)
    loss0 = jax.block_until_ready(rince_loss(scores_pos, scores_neg, q=0.0, lam=0.01))
    ref0 = _rince_ref(scores_pos, scores_neg, q=0.0, lam=0.01)
    assert jnp.allclose(loss0, ref0, rtol=1e-5, atol=1e-5), (loss0, ref0)

    # q != 0 branch (robust RINCE)
    loss_q = jax.block_until_ready(rince_loss(scores_pos, scores_neg, q=0.3, lam=0.01))
    ref_q = _rince_ref(scores_pos, scores_neg, q=0.3, lam=0.01)
    assert jnp.allclose(loss_q, ref_q, rtol=1e-5, atol=1e-5), (loss_q, ref_q)

    # Multi-tile batch grid + partial-tile row masking (forced small tile).
    N2, K2 = 20, 128
    sp2 = jax.random.normal(jax.random.PRNGKey(1), (N2, 1), dtype=jnp.float32)
    sn2 = jax.random.normal(jax.random.PRNGKey(2), (N2, K2), dtype=jnp.float32)
    loss2 = jax.block_until_ready(rince_loss(sp2, sn2, q=0.3, lam=0.01, tile_n=8))
    ref2 = _rince_ref(sp2, sn2, q=0.3, lam=0.01)
    assert jnp.allclose(loss2, ref2, rtol=1e-5, atol=1e-5), (loss2, ref2)

    # K-tiling path (2nd "arbitrary" grid axis) with partial last K tile
    # (column masking) and partial last batch tile (row masking).
    N3, K3 = 20, 200
    sp3 = jax.random.normal(jax.random.PRNGKey(3), (N3, 1), dtype=jnp.float32)
    sn3 = jax.random.normal(jax.random.PRNGKey(4), (N3, K3), dtype=jnp.float32)
    loss3 = jax.block_until_ready(
        rince_loss(sp3, sn3, q=0.3, lam=0.01, tile_n=8, tile_k=128))
    ref3 = _rince_ref(sp3, sn3, q=0.3, lam=0.01)
    assert jnp.allclose(loss3, ref3, rtol=1e-5, atol=1e-5), (loss3, ref3)
    loss3b = jax.block_until_ready(
        rince_loss(sp3, sn3, q=0.0, lam=0.01, tile_n=8, tile_k=128))
    ref3b = _rince_ref(sp3, sn3, q=0.0, lam=0.01)
    assert jnp.allclose(loss3b, ref3b, rtol=1e-5, atol=1e-5), (loss3b, ref3b)

    # lam == 0 (negative-pair-free limit), q != 0.
    loss_l0 = jax.block_until_ready(rince_loss(scores_pos, scores_neg, q=0.3, lam=0.0))
    ref_l0 = _rince_ref(scores_pos, scores_neg, q=0.3, lam=0.0)
    assert jnp.allclose(loss_l0, ref_l0, rtol=1e-5, atol=1e-5), (loss_l0, ref_l0)

    # bf16 storage path: streamed as bf16 (bf16 exp on v6e/v7x, upcast on v5e).
    loss_bf16 = jax.block_until_ready(
        rince_loss(scores_pos.astype(jnp.bfloat16),
                   scores_neg.astype(jnp.bfloat16), q=0.3, lam=0.01))
    ref_bf16 = _rince_ref(scores_pos.astype(jnp.bfloat16),
                          scores_neg.astype(jnp.bfloat16), q=0.3, lam=0.01)
    assert jnp.allclose(loss_bf16, ref_bf16, rtol=2e-2, atol=2e-2), (loss_bf16, ref_bf16)

    print("KERNEL_OK")
</pallas_src>

<mosaic_0001>
module attributes {stable_mosaic.version = 11 : i64} {
  func.func @_rince_kernel(%arg0: i32, %arg1: i32, %arg2: memref<8x1xf32, #tpu.memory_space<vmem>>, %arg3: memref<8x128xf32, #tpu.memory_space<vmem>>, %arg4: memref<1x8x128xf32, #tpu.memory_space<vmem>>, %arg5: memref<8x1xf32, #tpu.memory_space<vmem>>) attributes {dimension_semantics = [#tpu.dimension_semantics<parallel>, #tpu.dimension_semantics<arbitrary>], iteration_bounds = array<i64: 1, 1>, scalar_prefetch = 0 : i64, scratch_operands = 1 : i64, tpu.core_type = #tpu.core_type<tc>, window_params = [{transform_indices = @transform_0, window_bounds = array<i64: 8, 1>}, {transform_indices = @transform_1, window_bounds = array<i64: 8, 128>}, {transform_indices = @transform_2, window_bounds = array<i64: 1, 8, 128>}]} {
    %c0_i32 = arith.constant 0 : i32
    %0 = arith.cmpi eq, %arg1, %c0_i32 : i32
    %1 = arith.extui %0 : i1 to i32
    %c0_i32_0 = arith.constant 0 : i32
    %2 = arith.cmpi ne, %1, %c0_i32_0 : i32
    scf.if %2 {
      %cst_8 = arith.constant 0.000000e+00 : f32
      %13 = vector.broadcast %cst_8 : f32 to vector<8x1xf32>
      %c0_9 = arith.constant 0 : index
      %c0_10 = arith.constant 0 : index
      %14 = vector.load %arg5[%c0_9, %c0_10] : memref<8x1xf32, #tpu.memory_space<vmem>>, vector<8x1xf32>
      tpu.vector_store %arg5[%c0_9, %c0_10], %13 {strides = array<i32>} : memref<8x1xf32, #tpu.memory_space<vmem>>, vector<8x1xf32>,
    } else {
    }
    %c0 = arith.constant 0 : index
    %c0_1 = arith.constant 0 : index
    %3 = vector.load %arg3[%c0, %c0_1] : memref<8x128xf32, #tpu.memory_space<vmem>>, vector<8x128xf32>
    %4 = math.exp %3 : vector<8x128xf32>
    %c0_2 = arith.constant 0 : index
    %c0_3 = arith.constant 0 : index
    %5 = vector.load %arg5[%c0_2, %c0_3] : memref<8x1xf32, #tpu.memory_space<vmem>>, vector<8x1xf32>
    %cst = arith.constant dense<0.000000e+00> : vector<8xf32>
    %6 = vector.multi_reduction <add>, %4, %cst [1] : vector<8x128xf32> to vector<8xf32>
    %7 = vector.shape_cast %6 : vector<8xf32> to vector<8x1xf32>
    %8 = arith.addf %5, %7 : vector<8x1xf32>
    %c0_4 = arith.constant 0 : index
    %c0_5 = arith.constant 0 : index
    %9 = vector.load %arg5[%c0_4, %c0_5] : memref<8x1xf32, #tpu.memory_space<vmem>>, vector<8x1xf32>
    tpu.vector_store %arg5[%c0_4, %c0_5], %8 {strides = array<i32>} : memref<8x1xf32, #tpu.memory_space<vmem>>, vector<8x1xf32>,
    %c0_i32_6 = arith.constant 0 : i32
    %10 = arith.cmpi eq, %arg1, %c0_i32_6 : i32
    %11 = arith.extui %10 : i1 to i32
    %c0_i32_7 = arith.constant 0 : i32
    %12 = arith.cmpi ne, %11, %c0_i32_7 : i32
    scf.if %12 {
      %c0_8 = arith.constant 0 : index
      %c0_9 = arith.constant 0 : index
      %13 = vector.load %arg2[%c0_8, %c0_9] : memref<8x1xf32, #tpu.memory_space<vmem>>, vector<8x1xf32>
      %14 = math.exp %13 : vector<8x1xf32>
      %c0_10 = arith.constant 0 : index
      %c0_11 = arith.constant 0 : index
      %15 = vector.load %arg5[%c0_10, %c0_11] : memref<8x1xf32, #tpu.memory_space<vmem>>, vector<8x1xf32>
      %16 = arith.addf %14, %15 : vector<8x1xf32>
      %17 = math.log %16 : vector<8x1xf32>
      %18 = arith.subf %17, %13 : vector<8x1xf32>
      %19 = vector.shape_cast %18 : vector<8x1xf32> to vector<1x8x1xf32>
      %cst_12 = arith.constant dense<0.000000e+00> : vector<1xf32>
      %20 = vector.multi_reduction <add>, %19, %cst_12 [1, 2] : vector<1x8x1xf32> to vector<1xf32>
      %21 = vector.shape_cast %20 : vector<1xf32> to vector<1x1x1xf32>
      %22 = vector.extract %21[0, 0, 0] : f32 from vector<1x1x1xf32>
      %23 = vector.broadcast %22 : f32 to vector<1x8x128xf32>
      %c0_13 = arith.constant 0 : index
      %c0_14 = arith.constant 0 : index
      %c0_15 = arith.constant 0 : index
      %24 = vector.load %arg4[%c0_13, %c0_14, %c0_15] : memref<1x8x128xf32, #tpu.memory_space<vmem>>, vector<1x8x128xf32>
      tpu.vector_store %arg4[%c0_13, %c0_14, %c0_15], %23 {strides = array<i32>} : memref<1x8x128xf32, #tpu.memory_space<vmem>>, vector<1x8x128xf32>,
    } else {
    }
    return
  }
  func.func @transform_0(%arg0: i32, %arg1: i32) -> (i32, i32) {
    %c0_i32 = arith.constant 0 : i32
    %c0_i32_0 = arith.constant 0 : i32
    return %arg0, %c0_i32 : i32, i32
  }
  func.func @transform_1(%arg0: i32, %arg1: i32) -> (i32, i32) {
    %c0_i32 = arith.constant 0 : i32
    return %arg0, %arg1 : i32, i32
  }
  func.func @transform_2(%arg0: i32, %arg1: i32) -> (i32, i32, i32) {
    %c0_i32 = arith.constant 0 : i32
    %c0_i32_0 = arith.constant 0 : i32
    %c0_i32_1 = arith.constant 0 : i32
    return %arg0, %c0_i32, %c0_i32_0 : i32, i32, i32
  }
}

</mosaic_0001>

<bundles_post_ra>
// kernel: tpu_custom_call.1
= control target key start
LH: loop header
LB: loop body
LE: loop exit
PB: predicated region body
PF: predicated region fallthrough
CT: control target
= control target key end

     0   :  { %s136_s0 = inlined_call_operand.vmem [shape: f32[8,1], index: 0, kind: input, shape index: {}]   ;;  %s137_s1 = inlined_call_operand.vmem [shape: f32[8,128], index: 1, kind: input, shape index: {}]   ;;  %s138_s2 = inlined_call_operand.hbm [shape: f32[1,8,128], index: 2, kind: output, shape index: {}]  }
   0x1   :  { %v18_v0 = vld [vmem:[%s137_s1] sm:$0xff] }
   0x2   :  { %7 = vsyncpa [#allocation4], 0  ;;  %v19_v1 = vmul.f32 1.442695, %v18_v0  ;;  %vm16_vm0 = vcmask 7168   ;;  %v98_v3 = vmov 0.0  }
   0x3   :  { %17 = vst.msk [vmem:[#allocation2] sm:$0xff] %vm16_vm0, %v98_v3  ;;  %v30_v4 = vld [vmem:[%s136_s0] sm:$0xff]  ;;  %s99_s0 = smov [#allocation3]  }
   0x4   :  { %68 = vpow2.f32 %v19_v1  ;;  %v31_v5 = vmul.f32 1.442695, %v30_v4  ;;  %s56_s1 = sshll.u32 %s99_s0, 4  ;;  %s57_s1 = int_to_ptr.vmem [resolvable:$true] %s56_s1 }
   0x5   :  { %s74_s14 = scalar_lea.vmem %s57_s1, 128  ;;  %p79_p1 = scmp.lt.s32.totalorder %s57_s1, %s57_s1 }
   0x6   :  { %70 = vpow2.f32 %v31_v5  ;;  %p75_p0 = scmp.ne.s32.totalorder %s57_s1, %s74_s14  ;;  %p80_p2 = scmp.lt.s32.totalorder %s74_s14, %s74_s14 }
   0x8   :  { %p81_p3 = por %p80_p2, %p79_p1 }
   0xa   :  { %v21_v6 = vld [vmem:[#allocation2] sm:$0xff]  ;;  %p82_p4 = pnand %p81_p3, %p75_p0 }
   0xe   :  { %v69_v2 = vpop.eup %68 }
   0xf   :  { %22 = vadd.xlane.f32.xlu0 %v69_v2 }
  0x10   :  { %v71_v9 = vpop.eup %70 }
  0x9c   :  { %v23_v7 = vpop.xlane.xlu0 %22 }
  0x9d   :  { %v24_v8 = vadd.f32 %v23_v7, %v21_v6 }
  0x9f   :  { %26 = vst.msk [vmem:[#allocation2] sm:$0xff] %vm16_vm0, %v24_v8 }
  0xa6   :  { %v33_v10 = vld [vmem:[#allocation2] sm:$0xff] }
  0xa7   :  { %v34_v11 = vadd.f32 %v71_v9, %v33_v10 }
  0xa9   :  { %72 = vlog2.f32 %v34_v11 }
  0xb3   :  { %v73_v12 = vpop.eup %72 }
  0xb4   :  { %v36_v13 = vmul.f32 0.6931472, %v73_v12 }
  0xb6   :  { %v37_v14 = vsub.f32 %v36_v13, %v30_v4 }
  0xb8   :  { %v38_v15 = vsel %vm16_vm0, %v37_v14, 0.0 }
  0xb9   :  { %39 = vadd.xlane.f32.xlu0 %v38_v15 }
 0x146   :  { %v40_v16 = vpop.xlane.xlu0 %39 }
 0x147   :  { %v41_v17 = vrot.slane %v40_v16, 4 }
 0x149   :  { %v42_v18 = vadd.f32 %v41_v17, %v40_v16 }
 0x14b   :  { %v43_v19 = vrot.slane %v42_v18, 2 }
 0x14d   :  { %v44_v20 = vadd.f32 %v43_v19, %v42_v18 }
 0x14f   :  { %v45_v21 = vrot.slane %v44_v20, 1 }
 0x151   :  { %v46_v22 = vadd.f32 %v45_v21, %v44_v20 }
 0x153   :  { %64 = vpush %v46_v22 }
 0x184   :  { %s65_s13 = spop %64 }
 0x185   :  { %v48_v23 = vstv %s65_s13 }
 0x186   :  { %49 = vst [vmem:[#allocation3] sm:$0xff] %v48_v23 }
 0x187   :  { %85 = shalt.err (!%p82_p4)
}
 0x188   :  { %s86_s17 = scalar_lea.hbm %s138_s2, 128 }
 0x189   :  { %p87_p5 = scmp.ne.s32.totalorder %s138_s2, %s86_s17  ;;  %p90_p6 = scmp.lt.u32.totalorder %s86_s17, %s138_s2 }
 0x18b   :  { %p92_p7 = pnand %p90_p6, %p87_p5 }
 0x18d   :  { %95 = shalt.err (!%p92_p7)
}
 0x18e   :  { %59 = dma.vmem_to_hbm [thread:$0]  %s57_s1, 128, %s138_s2, [#allocation4]  }
 0x18f   :  { %96 = dma.done.wait [#allocation4], 128  }
 0x190   :  { %97 = vsyncadd [#allocation4], 4294967168 }
 0x191   :  { %63 = vsyncpa [#allocation4], 1 }

</bundles_post_ra>
